<compile_context>
chip_gen: v5e
topology: v5e:2x2
jax: 0.10.0
libtpu: 0.0.40
codegen_flags: <defaults>
</compile_context>

<pallas_src>
import numpy as np
import jax
import jax.numpy as jnp
from jax import lax
from jax.experimental import pallas as pl
from jax.experimental.pallas import tpu as pltpu


_TM_CAP = 8192  # max lane-dim (M) tile of the matmul


def _round_up(x, m):
    return (x + m - 1) // m * m


def _cdiv(a, b):
    return (a + b - 1) // b


def _make_deconv_kernel(nh, tm, ci, shifts):
    """Per-tile kernel body.

    Ref layout (fixed by the pallas_call below):
      w_ref    (4*CO, 4*ci)        folded per-phase weights   (grid-resident)
      b_ref    (4*CO, 1)           phase-replicated bias      (grid-resident)
      x_ref    (ci, tm)            main flat-input window     (streamed)
      halo_0.. (ci, 128)           right halo of the window   (streamed)
      o_ref    (4*CO, tm)          phase-major output tile    (lane dense)
      base_ref (ci, tm + nh*128)   VMEM scratch: contiguous window
      p_ref    (4*ci, tm)          VMEM scratch: patch matrix
    """
    def kernel(*refs):
        w_ref, b_ref, x_ref = refs[0], refs[1], refs[2]
        halo_refs = refs[3:3 + nh]
        o_ref = refs[3 + nh]
        base_ref, p_ref = refs[4 + nh], refs[5 + nh]

        # Contiguous input window [m0, m0 + tm + nh*128): all 128-aligned copies.
        base_ref[:, :tm] = x_ref[...]
        for j in range(nh):
            base_ref[:, tm + j * 128:tm + (j + 1) * 128] = halo_refs[j][...]

        # Patch matrix: 4 statically-shifted views of the same window, stacked
        # along K.  No im2col in HBM; ~4x less input traffic than materializing
        # the patch tensor outside the kernel.
        for t, s in enumerate(shifts):
            p_ref[t * ci:(t + 1) * ci, :] = base_ref[:, s:s + tm]

        acc = jnp.dot(w_ref[...], p_ref[...], preferred_element_type=jnp.float32)
        o_ref[...] = (acc + b_ref[...].astype(jnp.float32)).astype(o_ref.dtype)

    return kernel


def conv_transpose2d_bias(x_nchw, weight_iohw, bias, *, stride=2, padding=0):
    """PyTorch-semantics ConvTranspose2d + bias (NCHW), specialized to k=4, s=2, p=0."""
    N, CI, H, W = x_nchw.shape
    CI_w, CO, KH, KW = weight_iohw.shape
    assert CI == CI_w and KH == 4 and KW == 4 and stride == 2 and padding == 0

    Hq, Wq = H + 1, W + 1            # per-phase output extent
    Hp, Wp = Hq + 1, Wq + 1          # padded input extent (1-px halo each side)
    OH, OW = 2 * Hq, 2 * Wq          # == (H-1)*2 + 4
    CO4 = 4 * CO                     # (ph, pw, co)

    CI_pad = _round_up(CI, 8)        # aligned in-kernel sublane slices
    K = 4 * CI_pad                   # (dh, dw, ci)

    # --- M tiling -------------------------------------------------------------
    M_real = Hq * Wp                 # one throw-away column per output row
    tm = min(_TM_CAP, _round_up(M_real, 128))
    if N == 1:
        # >= 2 M blocks so the "parallel" M axis splits across v7x's two cores.
        tm = min(tm, _round_up(_cdiv(M_real, 2), 128))
    grid_m = _cdiv(M_real, tm)
    m_pad = grid_m * tm              # output M padded: all stores lane dense
    span = _round_up(Wp + 1, 128)    # right halo: largest tap shift is Wp+1
    nh = span // 128                 # number of 128-wide halo blocks
    l_xflat = m_pad + span           # padded flat-input length

    # --- folded per-phase weights / bias (tiny, pure reindexing) --------------
    #   W_f[(ph,pw,co),(dh,dw,ci)] = W[ci, co, kh=ph+2*(1-dh), kw=pw+2*(1-dw)]
    w_pad = jnp.pad(weight_iohw, ((0, CI_pad - CI), (0, 0), (0, 0), (0, 0)))
    w_r = w_pad.reshape(CI_pad, CO, 2, 2, 2, 2)        # [ci, co, jh, ph, jw, pw]
    w_r = w_r[:, :, ::-1, :, ::-1, :]                  # jh -> dh, jw -> dw
    w_mat = jnp.transpose(w_r, (3, 5, 1, 2, 4, 0)).reshape(CO4, K)
    b_mat = jnp.tile(bias, 4).reshape(CO4, 1)

    # --- flattened, zero-padded input (the only activation prep left in XLA) --
    xp = jnp.pad(x_nchw, ((0, 0), (0, CI_pad - CI), (1, 1), (1, 1)))
    xflat = xp.reshape(N, CI_pad, Hp * Wp)
    xflat = jnp.pad(xflat, ((0, 0), (0, 0), (0, l_xflat - Hp * Wp)))

    # --- pallas_call -----------------------------------------------------------
    bpt = tm // 128                  # main-tile width in 128-lane halo units
    x_spec = pl.BlockSpec((pl.Squeezed(), CI_pad, tm), lambda n, m: (n, 0, m))
    halo_specs = [
        pl.BlockSpec((pl.Squeezed(), CI_pad, 128),
                     lambda n, m, j=j: (n, 0, (m + 1) * bpt + j))
        for j in range(nh)
    ]
    w_spec = pl.BlockSpec((CO4, K), lambda n, m: (0, 0))
    b_spec = pl.BlockSpec((CO4, 1), lambda n, m: (0, 0))
    o_spec = pl.BlockSpec((pl.Squeezed(), CO4, tm), lambda n, m: (n, 0, m))

    shifts = (0, 1, Wp, Wp + 1)      # (dh, dw) = (0,0), (0,1), (1,0), (1,1)
    kernel = _make_deconv_kernel(nh=nh, tm=tm, ci=CI_pad, shifts=shifts)

    cost = pl.CostEstimate(
        flops=2 * K * CO4 * m_pad * N,
        transcendentals=0,
        bytes_accessed=2 * (N * CI_pad * l_xflat + CO4 * K + N * CO4 * m_pad))

    out_t = pl.pallas_call(
        kernel,
        out_shape=jax.ShapeDtypeStruct((N, CO4, m_pad), x_nchw.dtype),
        grid_spec=pltpu.PrefetchScalarGridSpec(
            num_scalar_prefetch=0,
            grid=(N, grid_m),
            in_specs=[w_spec, b_spec, x_spec] + halo_specs,
            out_specs=o_spec,
            scratch_shapes=[
                pltpu.VMEM((CI_pad, tm + nh * 128), x_nchw.dtype),  # window
                pltpu.VMEM((K, tm), x_nchw.dtype),                  # patch P
            ],
        ),
        compiler_params=pltpu.CompilerParams(
            dimension_semantics=("parallel", "parallel")),
        cost_estimate=cost,
    )(w_mat, b_mat, xflat, *([xflat] * nh))

    # --- phase interleave epilogue (single XLA transpose per layer) -----------
    out_t = out_t[:, :, :M_real].reshape(N, 2, 2, CO, Hq, Wp)[..., :Wq]
    out = jnp.transpose(out_t, (0, 3, 4, 1, 5, 2))     # (n, co, q, ph, r, pw)
    return out.reshape(N, CO, OH, OW)                  # NCHW


def ait_module_forward(x, params):
    (w1, b1), (w2, b2) = params
    x = conv_transpose2d_bias(x, w1, b1, stride=2, padding=0)
    x = conv_transpose2d_bias(x, w2, b2, stride=2, padding=0)
    return x


def _ref_conv_transpose(x_nchw, w_iohw, bias, *, stride, padding=0):
    """f32 XLA reference (lhs-dilated conv == conv_transpose)."""
    x = jnp.transpose(x_nchw, (0, 2, 3, 1)).astype(jnp.float32)
    CI, CO, KH, KW = w_iohw.shape
    w_hwio = jnp.transpose(w_iohw[:, :, ::-1, ::-1], (2, 3, 0, 1)).astype(jnp.float32)
    y = lax.conv_general_dilated(
        x, w_hwio, window_strides=(1, 1),
        padding=[(KH - 1 - padding,) * 2, (KW - 1 - padding,) * 2],
        lhs_dilation=(stride, stride),
        dimension_numbers=("NHWC", "HWIO", "NHWC"))
    y = y + bias.astype(jnp.float32)
    return jnp.transpose(y, (0, 3, 1, 2))


if __name__ == "__main__":
    key = jax.random.PRNGKey(0)
    k0, k1, k2, k3, k4 = jax.random.split(key, 5)

    # small shapes consistent with the module (orig: [1, 4, 128, 128] half)
    N, CIN, H, W = 2, 4, 16, 16
    dt = jnp.bfloat16  # TPU analogue of torch .half()

    x = jax.random.normal(k0, (N, CIN, H, W), jnp.float32).astype(dt)

    # ConvTranspose2d weight layout: (CI, CO, KH, KW)
    w1 = (jax.random.normal(k1, (4, 8, 4, 4), jnp.float32) * 0.1).astype(dt)
    b1 = (jax.random.normal(k2, (8,), jnp.float32) * 0.1).astype(dt)
    w2 = (jax.random.normal(k3, (8, 8, 4, 4), jnp.float32) * 0.1).astype(dt)
    b2 = (jax.random.normal(k4, (8,), jnp.float32) * 0.1).astype(dt)
    params = ((w1, b1), (w2, b2))

    out = jax.jit(ait_module_forward)(x, params)
    out = jax.block_until_ready(out)

    # shape check: (H-1)*2+4 = 34 -> (34-1)*2+4 = 70
    assert out.shape == (N, 8, 70, 70), out.shape

    # numerical check against an f32 XLA transposed-conv reference
    ref = _ref_conv_transpose(x, w1, b1, stride=2)
    ref = _ref_conv_transpose(ref.astype(dt), w2, b2, stride=2)
    np.testing.assert_allclose(np.asarray(out, np.float32),
                               np.asarray(ref, np.float32),
                               rtol=5e-2, atol=5e-2)

    print("KERNEL_OK")
</pallas_src>

<mosaic_0001>
module attributes {stable_mosaic.version = 11 : i64} {
  func.func @kernel(%arg0: i32, %arg1: i32, %arg2: memref<32x32xbf16, #tpu.memory_space<vmem>>, %arg3: memref<32x1xbf16, #tpu.memory_space<vmem>>, %arg4: memref<1x8x384xbf16, #tpu.memory_space<vmem>>, %arg5: memref<1x8x128xbf16, #tpu.memory_space<vmem>>, %arg6: memref<1x32x384xbf16, #tpu.memory_space<vmem>>, %arg7: memref<8x512xbf16, #tpu.memory_space<vmem>>, %arg8: memref<32x384xbf16, #tpu.memory_space<vmem>>) attributes {dimension_semantics = [#tpu.dimension_semantics<parallel>, #tpu.dimension_semantics<parallel>], iteration_bounds = array<i64: 2, 1>, scalar_prefetch = 0 : i64, scratch_operands = 2 : i64, tpu.core_type = #tpu.core_type<tc>, window_params = [{pipeline_mode = #tpu.pipeline_mode<synchronous>, transform_indices = @transform_0, window_bounds = array<i64: 32, 32>}, {pipeline_mode = #tpu.pipeline_mode<synchronous>, transform_indices = @transform_1, window_bounds = array<i64: 32, 1>}, {transform_indices = @transform_2, window_bounds = array<i64: 1, 8, 384>}, {transform_indices = @transform_3, window_bounds = array<i64: 1, 8, 128>}, {transform_indices = @transform_4, window_bounds = array<i64: 1, 32, 384>}]} {
    %c0 = arith.constant 0 : index
    %c0_0 = arith.constant 0 : index
    %c0_1 = arith.constant 0 : index
    %0 = vector.load %arg4[%c0, %c0_0, %c0_1] : memref<1x8x384xbf16, #tpu.memory_space<vmem>>, vector<1x8x384xbf16>
    %1 = vector.shape_cast %0 : vector<1x8x384xbf16> to vector<8x384xbf16>
    %c0_2 = arith.constant 0 : index
    %c0_3 = arith.constant 0 : index
    %2 = vector.load %arg7[%c0_2, %c0_3] : memref<8x512xbf16, #tpu.memory_space<vmem>>, vector<8x384xbf16>
    tpu.vector_store %arg7[%c0_2, %c0_3], %1 {strides = array<i32>} : memref<8x512xbf16, #tpu.memory_space<vmem>>, vector<8x384xbf16>,
    %c0_4 = arith.constant 0 : index
    %c0_5 = arith.constant 0 : index
    %c0_6 = arith.constant 0 : index
    %3 = vector.load %arg5[%c0_4, %c0_5, %c0_6] : memref<1x8x128xbf16, #tpu.memory_space<vmem>>, vector<1x8x128xbf16>
    %4 = vector.shape_cast %3 : vector<1x8x128xbf16> to vector<8x128xbf16>
    %c0_7 = arith.constant 0 : index
    %c384 = arith.constant 384 : index
    %5 = vector.load %arg7[%c0_7, %c384] : memref<8x512xbf16, #tpu.memory_space<vmem>>, vector<8x128xbf16>
    tpu.vector_store %arg7[%c0_7, %c384], %4 {strides = array<i32>} : memref<8x512xbf16, #tpu.memory_space<vmem>>, vector<8x128xbf16>,
    %c0_8 = arith.constant 0 : index
    %c0_9 = arith.constant 0 : index
    %6 = vector.load %arg7[%c0_8, %c0_9] : memref<8x512xbf16, #tpu.memory_space<vmem>>, vector<8x384xbf16>
    %c0_10 = arith.constant 0 : index
    %c0_11 = arith.constant 0 : index
    %7 = vector.load %arg8[%c0_10, %c0_11] : memref<32x384xbf16, #tpu.memory_space<vmem>>, vector<8x384xbf16>
    tpu.vector_store %arg8[%c0_10, %c0_11], %6 {strides = array<i32>} : memref<32x384xbf16, #tpu.memory_space<vmem>>, vector<8x384xbf16>,
    %c0_12 = arith.constant 0 : index
    %c1 = arith.constant 1 : index
    %8 = vector.load %arg7[%c0_12, %c1] : memref<8x512xbf16, #tpu.memory_space<vmem>>, vector<8x384xbf16>
    %c8 = arith.constant 8 : index
    %c0_13 = arith.constant 0 : index
    %9 = vector.load %arg8[%c8, %c0_13] : memref<32x384xbf16, #tpu.memory_space<vmem>>, vector<8x384xbf16>
    tpu.vector_store %arg8[%c8, %c0_13], %8 {strides = array<i32>} : memref<32x384xbf16, #tpu.memory_space<vmem>>, vector<8x384xbf16>,
    %c0_14 = arith.constant 0 : index
    %c18 = arith.constant 18 : index
    %10 = vector.load %arg7[%c0_14, %c18] : memref<8x512xbf16, #tpu.memory_space<vmem>>, vector<8x384xbf16>
    %c16 = arith.constant 16 : index
    %c0_15 = arith.constant 0 : index
    %11 = vector.load %arg8[%c16, %c0_15] : memref<32x384xbf16, #tpu.memory_space<vmem>>, vector<8x384xbf16>
    tpu.vector_store %arg8[%c16, %c0_15], %10 {strides = array<i32>} : memref<32x384xbf16, #tpu.memory_space<vmem>>, vector<8x384xbf16>,
    %c0_16 = arith.constant 0 : index
    %c19 = arith.constant 19 : index
    %12 = vector.load %arg7[%c0_16, %c19] : memref<8x512xbf16, #tpu.memory_space<vmem>>, vector<8x384xbf16>
    %c24 = arith.constant 24 : index
    %c0_17 = arith.constant 0 : index
    %13 = vector.load %arg8[%c24, %c0_17] : memref<32x384xbf16, #tpu.memory_space<vmem>>, vector<8x384xbf16>
    tpu.vector_store %arg8[%c24, %c0_17], %12 {strides = array<i32>} : memref<32x384xbf16, #tpu.memory_space<vmem>>, vector<8x384xbf16>,
    %c0_18 = arith.constant 0 : index
    %c0_19 = arith.constant 0 : index
    %14 = vector.load %arg2[%c0_18, %c0_19] : memref<32x32xbf16, #tpu.memory_space<vmem>>, vector<32x32xbf16>
    %c0_20 = arith.constant 0 : index
    %c0_21 = arith.constant 0 : index
    %15 = vector.load %arg8[%c0_20, %c0_21] : memref<32x384xbf16, #tpu.memory_space<vmem>>, vector<32x384xbf16>
    %cst = arith.constant dense<0.000000e+00> : vector<32x384xf32>
    %16 = tpu.matmul %14, %15, %cst {dimension_numbers = #tpu.dot_dimension_numbers<[1], [0], [0], [1], [0, 0, 1, 1], [], []>} : vector<32x32xbf16>, vector<32x384xbf16>, vector<32x384xf32> -> vector<32x384xf32>
    %c0_22 = arith.constant 0 : index
    %c0_23 = arith.constant 0 : index
    %17 = vector.load %arg3[%c0_22, %c0_23] : memref<32x1xbf16, #tpu.memory_space<vmem>>, vector<32x1xbf16>
    %18 = arith.extf %17 : vector<32x1xbf16> to vector<32x1xf32>
    %19 = vector.broadcast %18 : vector<32x1xf32> to vector<32x384xf32>
    %20 = arith.addf %16, %19 : vector<32x384xf32>
    %21 = arith.truncf %20 : vector<32x384xf32> to vector<32x384xbf16>
    %c0_24 = arith.constant 0 : index
    %c0_25 = arith.constant 0 : index
    %c0_26 = arith.constant 0 : index
    %22 = vector.load %arg6[%c0_24, %c0_25, %c0_26] : memref<1x32x384xbf16, #tpu.memory_space<vmem>>, vector<1x32x384xbf16>
    %23 = vector.shape_cast %22 : vector<1x32x384xbf16> to vector<32x384xbf16>
    %24 = vector.shape_cast %21 : vector<32x384xbf16> to vector<1x32x384xbf16>
    tpu.vector_store %arg6[%c0_24, %c0_25, %c0_26], %24 {strides = array<i32>} : memref<1x32x384xbf16, #tpu.memory_space<vmem>>, vector<1x32x384xbf16>,
    return
  }
  func.func @transform_0(%arg0: i32, %arg1: i32) -> (i32, i32) {
    %c0_i32 = arith.constant 0 : i32
    %c0_i32_0 = arith.constant 0 : i32
    %c0_i32_1 = arith.constant 0 : i32
    return %c0_i32, %c0_i32_0 : i32, i32
  }
  func.func @transform_1(%arg0: i32, %arg1: i32) -> (i32, i32) {
    %c0_i32 = arith.constant 0 : i32
    %c0_i32_0 = arith.constant 0 : i32
    %c0_i32_1 = arith.constant 0 : i32
    return %c0_i32, %c0_i32_0 : i32, i32
  }
  func.func @transform_2(%arg0: i32, %arg1: i32) -> (i32, i32, i32) {
    %c0_i32 = arith.constant 0 : i32
    %c0_i32_0 = arith.constant 0 : i32
    return %arg0, %c0_i32, %arg1 : i32, i32, i32
  }
  func.func @transform_3(%arg0: i32, %arg1: i32) -> (i32, i32, i32) {
    %c1_i32 = arith.constant 1 : i32
    %0 = arith.addi %arg1, %c1_i32 : i32
    %c3_i32 = arith.constant 3 : i32
    %1 = arith.muli %0, %c3_i32 : i32
    %c0_i32 = arith.constant 0 : i32
    %2 = arith.addi %1, %c0_i32 : i32
    %c0_i32_0 = arith.constant 0 : i32
    %c0_i32_1 = arith.constant 0 : i32
    return %arg0, %c0_i32_0, %2 : i32, i32, i32
  }
  func.func @transform_4(%arg0: i32, %arg1: i32) -> (i32, i32, i32) {
    %c0_i32 = arith.constant 0 : i32
    %c0_i32_0 = arith.constant 0 : i32
    return %arg0, %c0_i32, %arg1 : i32, i32, i32
  }
}

module attributes {stable_mosaic.version = 11 : i64} {
  func.func @kernel(%arg0: i32, %arg1: i32, %arg2: memref<32x32xbf16, #tpu.memory_space<vmem>>, %arg3: memref<32x1xbf16, #tpu.memory_space<vmem>>, %arg4: memref<1x8x1280xbf16, #tpu.memory_space<vmem>>, %arg5: memref<1x8x128xbf16, #tpu.memory_space<vmem>>, %arg6: memref<1x32x1280xbf16, #tpu.memory_space<vmem>>, %arg7: memref<8x1408xbf16, #tpu.memory_space<vmem>>, %arg8: memref<32x1280xbf16, #tpu.memory_space<vmem>>) attributes {dimension_semantics = [#tpu.dimension_semantics<parallel>, #tpu.dimension_semantics<parallel>], iteration_bounds = array<i64: 2, 1>, scalar_prefetch = 0 : i64, scratch_operands = 2 : i64, tpu.core_type = #tpu.core_type<tc>, window_params = [{pipeline_mode = #tpu.pipeline_mode<synchronous>, transform_indices = @transform_0, window_bounds = array<i64: 32, 32>}, {pipeline_mode = #tpu.pipeline_mode<synchronous>, transform_indices = @transform_1, window_bounds = array<i64: 32, 1>}, {transform_indices = @transform_2, window_bounds = array<i64: 1, 8, 1280>}, {transform_indices = @transform_3, window_bounds = array<i64: 1, 8, 128>}, {transform_indices = @transform_4, window_bounds = array<i64: 1, 32, 1280>}]} {
    %c0 = arith.constant 0 : index
    %c0_0 = arith.constant 0 : index
    %c0_1 = arith.constant 0 : index
    %0 = vector.load %arg4[%c0, %c0_0, %c0_1] : memref<1x8x1280xbf16, #tpu.memory_space<vmem>>, vector<1x8x1280xbf16>
    %1 = vector.shape_cast %0 : vector<1x8x1280xbf16> to vector<8x1280xbf16>
    %c0_2 = arith.constant 0 : index
    %c0_3 = arith.constant 0 : index
    %2 = vector.load %arg7[%c0_2, %c0_3] : memref<8x1408xbf16, #tpu.memory_space<vmem>>, vector<8x1280xbf16>
    tpu.vector_store %arg7[%c0_2, %c0_3], %1 {strides = array<i32>} : memref<8x1408xbf16, #tpu.memory_space<vmem>>, vector<8x1280xbf16>,
    %c0_4 = arith.constant 0 : index
    %c0_5 = arith.constant 0 : index
    %c0_6 = arith.constant 0 : index
    %3 = vector.load %arg5[%c0_4, %c0_5, %c0_6] : memref<1x8x128xbf16, #tpu.memory_space<vmem>>, vector<1x8x128xbf16>
    %4 = vector.shape_cast %3 : vector<1x8x128xbf16> to vector<8x128xbf16>
    %c0_7 = arith.constant 0 : index
    %c1280 = arith.constant 1280 : index
    %5 = vector.load %arg7[%c0_7, %c1280] : memref<8x1408xbf16, #tpu.memory_space<vmem>>, vector<8x128xbf16>
    tpu.vector_store %arg7[%c0_7, %c1280], %4 {strides = array<i32>} : memref<8x1408xbf16, #tpu.memory_space<vmem>>, vector<8x128xbf16>,
    %c0_8 = arith.constant 0 : index
    %c0_9 = arith.constant 0 : index
    %6 = vector.load %arg7[%c0_8, %c0_9] : memref<8x1408xbf16, #tpu.memory_space<vmem>>, vector<8x1280xbf16>
    %c0_10 = arith.constant 0 : index
    %c0_11 = arith.constant 0 : index
    %7 = vector.load %arg8[%c0_10, %c0_11] : memref<32x1280xbf16, #tpu.memory_space<vmem>>, vector<8x1280xbf16>
    tpu.vector_store %arg8[%c0_10, %c0_11], %6 {strides = array<i32>} : memref<32x1280xbf16, #tpu.memory_space<vmem>>, vector<8x1280xbf16>,
    %c0_12 = arith.constant 0 : index
    %c1 = arith.constant 1 : index
    %8 = vector.load %arg7[%c0_12, %c1] : memref<8x1408xbf16, #tpu.memory_space<vmem>>, vector<8x1280xbf16>
    %c8 = arith.constant 8 : index
    %c0_13 = arith.constant 0 : index
    %9 = vector.load %arg8[%c8, %c0_13] : memref<32x1280xbf16, #tpu.memory_space<vmem>>, vector<8x1280xbf16>
    tpu.vector_store %arg8[%c8, %c0_13], %8 {strides = array<i32>} : memref<32x1280xbf16, #tpu.memory_space<vmem>>, vector<8x1280xbf16>,
    %c0_14 = arith.constant 0 : index
    %c36 = arith.constant 36 : index
    %10 = vector.load %arg7[%c0_14, %c36] : memref<8x1408xbf16, #tpu.memory_space<vmem>>, vector<8x1280xbf16>
    %c16 = arith.constant 16 : index
    %c0_15 = arith.constant 0 : index
    %11 = vector.load %arg8[%c16, %c0_15] : memref<32x1280xbf16, #tpu.memory_space<vmem>>, vector<8x1280xbf16>
    tpu.vector_store %arg8[%c16, %c0_15], %10 {strides = array<i32>} : memref<32x1280xbf16, #tpu.memory_space<vmem>>, vector<8x1280xbf16>,
    %c0_16 = arith.constant 0 : index
    %c37 = arith.constant 37 : index
    %12 = vector.load %arg7[%c0_16, %c37] : memref<8x1408xbf16, #tpu.memory_space<vmem>>, vector<8x1280xbf16>
    %c24 = arith.constant 24 : index
    %c0_17 = arith.constant 0 : index
    %13 = vector.load %arg8[%c24, %c0_17] : memref<32x1280xbf16, #tpu.memory_space<vmem>>, vector<8x1280xbf16>
    tpu.vector_store %arg8[%c24, %c0_17], %12 {strides = array<i32>} : memref<32x1280xbf16, #tpu.memory_space<vmem>>, vector<8x1280xbf16>,
    %c0_18 = arith.constant 0 : index
    %c0_19 = arith.constant 0 : index
    %14 = vector.load %arg2[%c0_18, %c0_19] : memref<32x32xbf16, #tpu.memory_space<vmem>>, vector<32x32xbf16>
    %c0_20 = arith.constant 0 : index
    %c0_21 = arith.constant 0 : index
    %15 = vector.load %arg8[%c0_20, %c0_21] : memref<32x1280xbf16, #tpu.memory_space<vmem>>, vector<32x1280xbf16>
    %cst = arith.constant dense<0.000000e+00> : vector<32x1280xf32>
    %16 = tpu.matmul %14, %15, %cst {dimension_numbers = #tpu.dot_dimension_numbers<[1], [0], [0], [1], [0, 0, 1, 1], [], []>} : vector<32x32xbf16>, vector<32x1280xbf16>, vector<32x1280xf32> -> vector<32x1280xf32>
    %c0_22 = arith.constant 0 : index
    %c0_23 = arith.constant 0 : index
    %17 = vector.load %arg3[%c0_22, %c0_23] : memref<32x1xbf16, #tpu.memory_space<vmem>>, vector<32x1xbf16>
    %18 = arith.extf %17 : vector<32x1xbf16> to vector<32x1xf32>
    %19 = vector.broadcast %18 : vector<32x1xf32> to vector<32x1280xf32>
    %20 = arith.addf %16, %19 : vector<32x1280xf32>
    %21 = arith.truncf %20 : vector<32x1280xf32> to vector<32x1280xbf16>
    %c0_24 = arith.constant 0 : index
    %c0_25 = arith.constant 0 : index
    %c0_26 = arith.constant 0 : index
    %22 = vector.load %arg6[%c0_24, %c0_25, %c0_26] : memref<1x32x1280xbf16, #tpu.memory_space<vmem>>, vector<1x32x1280xbf16>
    %23 = vector.shape_cast %22 : vector<1x32x1280xbf16> to vector<32x1280xbf16>
    %24 = vector.shape_cast %21 : vector<32x1280xbf16> to vector<1x32x1280xbf16>
    tpu.vector_store %arg6[%c0_24, %c0_25, %c0_26], %24 {strides = array<i32>} : memref<1x32x1280xbf16, #tpu.memory_space<vmem>>, vector<1x32x1280xbf16>,
    return
  }
  func.func @transform_0(%arg0: i32, %arg1: i32) -> (i32, i32) {
    %c0_i32 = arith.constant 0 : i32
    %c0_i32_0 = arith.constant 0 : i32
    %c0_i32_1 = arith.constant 0 : i32
    return %c0_i32, %c0_i32_0 : i32, i32
  }
  func.func @transform_1(%arg0: i32, %arg1: i32) -> (i32, i32) {
    %c0_i32 = arith.constant 0 : i32
    %c0_i32_0 = arith.constant 0 : i32
    %c0_i32_1 = arith.constant 0 : i32
    return %c0_i32, %c0_i32_0 : i32, i32
  }
  func.func @transform_2(%arg0: i32, %arg1: i32) -> (i32, i32, i32) {
    %c0_i32 = arith.constant 0 : i32
    %c0_i32_0 = arith.constant 0 : i32
    return %arg0, %c0_i32, %arg1 : i32, i32, i32
  }
  func.func @transform_3(%arg0: i32, %arg1: i32) -> (i32, i32, i32) {
    %c1_i32 = arith.constant 1 : i32
    %0 = arith.addi %arg1, %c1_i32 : i32
    %c10_i32 = arith.constant 10 : i32
    %1 = arith.muli %0, %c10_i32 : i32
    %c0_i32 = arith.constant 0 : i32
    %2 = arith.addi %1, %c0_i32 : i32
    %c0_i32_0 = arith.constant 0 : i32
    %c0_i32_1 = arith.constant 0 : i32
    return %arg0, %c0_i32_0, %2 : i32, i32, i32
  }
  func.func @transform_4(%arg0: i32, %arg1: i32) -> (i32, i32, i32) {
    %c0_i32 = arith.constant 0 : i32
    %c0_i32_0 = arith.constant 0 : i32
    return %arg0, %c0_i32, %arg1 : i32, i32, i32
  }
}

</mosaic_0001>

<bundles_post_ra>
// kernel: tile.0
= control target key start
LH: loop header
LB: loop body
LE: loop exit
PB: predicated region body
PF: predicated region fallthrough
CT: control target
= control target key end

     0   :  { %s112_s8 = smov 125   ;;  %s113_s9 = smov 123   ;;  %vm18_vm0 = vcmask 7168   ;;  %s145_s0 = inlined_call_operand.vmem [shape: bf16[4,8], index: 0, kind: input, shape index: {}]   ;;  %s146_s1 = inlined_call_operand.vmem [shape: bf16[32,1], index: 1, kind: output, shape index: {}]  }
   0x1   :  { %v13_v0 = vld [vmem:[%s145_s0] sm:$0x3]  ;;  %s111_s0 = smov 127   ;;  %s114_s10 = smov 126  }
   0x2   :  { %v14_v1 = vunpack.c.l.bf16 %v13_v0  ;;  %s115_s11 = smov 124   ;;  %s116_s12 = smov 122  }
   0x3   :  { %s117_s13 = smov 121  }
   0x4   :  { %16 = vst [vmem:[#allocation1] sm:$0xf] %v14_v1 }
   0xb   :  { %v20_v2 = vld [vmem:[#allocation1] sm:$0xf]  }
   0xc   :  { %v32_v3 = vld [vmem:[#allocation1] sm:$0xf]   ;;  %21 = vrot.lane.b32.xlu0 %v20_v2, %s111_s0 }
   0xd   :  { %33 = vrot.lane.b32.xlu1 %v32_v3, %s112_s8  ;;  %v44_v4 = vld [vmem:[#allocation1] sm:$0xf]  }
   0xe   :  { %45 = vrot.lane.b32.xlu2 %v44_v4, %s113_s9  ;;  %v26_v5 = vld [vmem:[#allocation1] sm:$0xf]  }
   0xf   :  { %v38_v6 = vld [vmem:[#allocation1] sm:$0xf]  }
  0x10   :  { %v50_v7 = vld [vmem:[#allocation1] sm:$0xf]  }
  0x11   :  { %v56_v8 = vld [vmem:[#allocation1] sm:$0xf]  }
  0x12   :  { %v17_v9 = vld [vmem:[#allocation1] sm:$0xf]  }
  0x13   :  { %19 = vst.msk [vmem:[#allocation0] ss:$8 sm:$0xf] %vm18_vm0, %v17_v9  }
  0x14   :  { %27 = vrot.lane.b32.xlu0 %v26_v5, %s114_s10 }
  0x15   :  { %39 = vrot.lane.b32.xlu1 %v38_v6, %s115_s11 }
  0x16   :  { %51 = vrot.lane.b32.xlu2 %v50_v7, %s116_s12 }
  0x1c   :  { %57 = vrot.lane.b32.xlu0 %v56_v8, %s117_s13 }
  0x68   :  { %v46_v10 = vpop.permute.xlu2 %45  }
  0x69   :  { %49 = vst.msk [vmem:[#allocation0 + $0x5] ss:$8 sm:$0xf] %vm18_vm0, %v46_v10  }
  0x70   :  { %v52_v11 = vpop.permute.xlu2 %51  }
  0x71   :  { %55 = vst.msk [vmem:[#allocation0 + $0x6] ss:$8 sm:$0xf] %vm18_vm0, %v52_v11  }
  0x7e   :  { %v22_v12 = vpop.permute.xlu0 %21  }
  0x7f   :  { %v34_v13 = vpop.permute.xlu1 %33   ;;  %25 = vst.msk [vmem:[#allocation0 + $0x1] ss:$8 sm:$0xf] %vm18_vm0, %v22_v12  }
  0x80   :  { %37 = vst.msk [vmem:[#allocation0 + $0x3] ss:$8 sm:$0xf] %vm18_vm0, %v34_v13  }
  0x86   :  { %v28_v14 = vpop.permute.xlu0 %27  }
  0x87   :  { %v40_v15 = vpop.permute.xlu1 %39   ;;  %31 = vst.msk [vmem:[#allocation0 + $0x2] ss:$8 sm:$0xf] %vm18_vm0, %v28_v14  }
  0x88   :  { %43 = vst.msk [vmem:[#allocation0 + $0x4] ss:$8 sm:$0xf] %vm18_vm0, %v40_v15  }
  0x8e   :  { %v58_v16 = vpop.permute.xlu0 %57  }
  0x8f   :  { %61 = vst.msk [vmem:[#allocation0 + $0x7] ss:$8 sm:$0xf] %vm18_vm0, %v58_v16  }
  0x96   :  { %v64_v17 = vld [vmem:[#allocation0] sm:$0xff]  ;;  %v70_v18 = vld [vmem:[#allocation0 + $0x8] sm:$0xff]  ;;  %v77_v19 = vld [vmem:[#allocation0 + $0x10] sm:$0xff] }
  0x97   :  { %v96_v20 = vpack.c.bf16 %v70_v18, %v64_v17  ;;  %v84_v21 = vld [vmem:[#allocation0 + $0x18] sm:$0xff] }
  0x98   :  { %v101_v22 = vpack.c.bf16 %v84_v21, %v77_v19 }
  0x99   :  { %97 = vst [vmem:[%s146_s1] sm:$0xff] %v96_v20  }
  0x9a   :  { %103 = vst [vmem:[%s146_s1 + $0x8] sm:$0xff] %v101_v22  }

// kernel: tile.13
= control target key start
LH: loop header
LB: loop body
LE: loop exit
PB: predicated region body
PF: predicated region fallthrough
CT: control target
= control target key end

     0   :  { %2 = vsyncpa [#allocation1], 0  ;;  %s53_s8 = smov [#allocation0]   ;;  %s70_s0 = inlined_call_operand.hbm [shape: bf16[8], index: 0, kind: input, shape index: {}]   ;;  %s71_s1 = inlined_call_operand.vmem [shape: bf16[4,8], index: 1, kind: output, shape index: {}]  }
   0x1   :  { %s8_s0 = sshll.u32 %s70_s0, 4  ;;  %s10_s9 = sshll.u32 %s53_s8, 4  ;;  %s9_s0 = int_to_ptr.hbm [resolvable:$true] %s8_s0  ;;  %s11_s9 = int_to_ptr.vmem [resolvable:$true] %s10_s9 }
   0x2   :  { %13 = dma.hbm_to_vmem [thread:$0]  %s9_s0, 16, %s11_s9, [#allocation1]  }
   0x3   :  { %51 = dma.done.wait [#allocation1], 16  }
   0x4   :  { %52 = vsyncadd [#allocation1], 4294967280  ;;  %v18_v0 = vld [vmem:[#allocation0] ss:$0 sm:$0xff] }
   0x5   :  { %v19_v1 = vunpack.i.l.bf16 %v18_v0 }
   0x7   :  { %v23_v2 = vpack.c.bf16 0.0, %v19_v1 }
   0x9   :  { %24 = vst [vmem:[%s71_s1] sm:$0x3] %v23_v2 }
   0xa   :  { %25 = vsyncpa [#allocation1], 1 }

// kernel: ait_module_forward.2
= control target key start
LH: loop header
LB: loop body
LE: loop exit
PB: predicated region body
PF: predicated region fallthrough
CT: control target
= control target key end

     0   :  { %s802_s15 = smov 0   ;;  %s804_s16 = smov 0   ;;  %s871_s0 = inlined_call_operand.vmem [shape: bf16[32,32], index: 0, kind: input, shape index: {}]   ;;  %s872_s1 = inlined_call_operand.vmem [shape: bf16[32,1], index: 1, kind: input, shape index: {}]   ;;  %s873_s2 = inlined_call_operand.vmem [shape: bf16[2,8,512], index: 2, kind: input, shape index: {}, may-alias: {2,3}]   ;;  %s874_s3 = inlined_call_operand.vmem [shape: bf16[2,8,512], index: 3, kind: input, shape index: {}, may-alias: {2,3}]   ;;  %s875_s4 = inlined_call_operand.vmem [shape: bf16[2,32,384], index: 4, kind: output, shape index: {}]  }
   0x1   :  { %s806_s17 = smov 0  }
   0x2 LB: > { %s26_s18 = sadd.s32 1, %s767_s16  ;;  %p639_p0 = scmp.ge.s32.totalorder %s771_s17, 1  ;;  %s771_s17 = sphi %s806_s17, %s14_s17   ;;  %s767_s16 = sphi %s804_s16, %s877_s16   ;;  %s763_s15 = sphi %s802_s15, %s876_s15  }
   0x3   : > { %p28_p1 = scmp.ge.s32.totalorder %s26_s18, 2  ;;  %p214_p2 = scmp.lt.s32.totalorder %s771_s17, 3 }
   0x5   : > { %s879_s18 = smov (%p28_p1, %s26_s18), 0  ;;  %p215_p3 = pnand %p639_p0, %p214_p2 }
   0x6   : > { %p267_p4 = scmp.lt.s32.totalorder (!%p215_p3), %s763_s15, 1  ;;  %s773_s27 = smov (!%p215_p3), 109  }
   0x7   : > { %218 = sbr.rel (%p215_p3) target bundleno = 329 (0x149), region = 36  ;;  %s774_s28 = smov (!%p215_p3), 127  }
   0x8   : > { %s775_s29 = smov (!%p215_p3), 110  }
   0xc   : > { %s881_s15 = smov (!%p267_p4, %s763_s15), 1  ;;  %vm343_vm0 = vcmask 900096   ;;  %vm325_vm1 = vcmask 1039360   ;;  %vm323_vm2 = vcmask 1043456   ;;  %v697_v10 = vld [vmem:[%s872_s1] sm:$0xff]   ;;  %v776_v13 = vmov 0  }
   0xd   : > { %s685_s19 = sshll.u32 %s881_s15, 4  ;;  %737 = vset.pattern.permute.xlu0 %v776_v13  ;;  %v698_v14 = vunpack.c.l.bf16 %v697_v10  ;;  %v699_v15 = vunpack.c.h.bf16 %v697_v10  ;;  %743 = vset.pattern.permute.xlu1 %v776_v13  ;;  %vm361_vm3 = vcmask 891904   ;;  %v705_v31 = vld [vmem:[%s872_s1 + $0x8] sm:$0xff]   ;;  %v688_v51 = vld [vmem:[%s871_s0] sm:$0xff]  ;;  %vm450_vm4 = vcmask 261120   ;;  %s708_s12 = smul.u32 48, %s881_s15 }
   0xe   : > { %s274_s22 = scalar_lea.vmem %s873_s2, %s685_s19  ;;  %s687_s23 = sadd.s32 12, %s685_s19  ;;  %v702_v32 = vunpack.c.l.bf16 %v705_v31  ;;  %v703_v33 = vunpack.c.h.bf16 %v705_v31  ;;  %v689_v54 = vld [vmem:[%s871_s0 + $0x8] sm:$0xff] }
   0xf   : > { %s289_s26 = scalar_lea.vmem %s874_s3, %s687_s23  ;;  %v304_v0 = vld [vmem:[%s274_s22 + $0x8] sm:$0xf]  ;;  %v303_v1 = vld [vmem:[%s274_s22] sm:$0xff]  ;;  %v738_v19 = vpack.i.bf16 %v699_v15, %v698_v14  ;;  %s852_s19 = scalar_lea.vmem %s875_s4, %s708_s12 }
  0x10   : > { %306 = vst [vmem:[#allocation2 + $0x8] sm:$0xf] %v304_v0  ;;  %v307_v2 = vld [vmem:[%s289_s26] sm:$0xf]  ;;  %354 = vrot.lane.b32.xlu2 %v303_v1, %s773_s27  ;;  %v744_v36 = vpack.i.bf16 %v703_v33, %v702_v32 }
  0x11   : > { %308 = vst [vmem:[#allocation2 + $0xc] sm:$0xf] %v307_v2 }
  0x12   : > { %311 = vst [vmem:[#allocation3] sm:$0xff] %v303_v1 }
  0x17   : > { %v310_v4 = vld [vmem:[#allocation2 + $0x8] sm:$0xf] }
  0x18   : > { %v333_v3 = vld [vmem:[#allocation2 + $0x8] sm:$0xff]  ;;  %317 = vrot.lane.b32.xlu2 %v303_v1, %s774_s28  ;;  %312 = vst [vmem:[#allocation3 + $0x8] sm:$0xf] %v310_v4 }
  0x19   : > { %338 = vrot.lane.b32.xlu0 %v333_v3, %s775_s29  ;;  %319 = vrot.lane.b32.xlu1 %v333_v3, %s774_s28  ;;  %v655_v46 = vld [vmem:[#allocation3] sm:$0xf]  ;;  %v690_v49 = vld [vmem:[#allocation3 + $0x4] sm:$0xf] }
  0x1f   : > { %v663_v40 = vld [vmem:[#allocation3 + $0x8] sm:$0xf] }
  0x21   : > { %356 = vrot.lane.b32.xlu0 %v333_v3, %s773_s27  ;;  %336 = vrot.lane.b32.xlu1 %v303_v1, %s775_s29 }
  0x29   : > { %739 = vperm.xlu0 %737, %v738_v19   ;;  %745 = vperm.xlu1 %743, %v744_v36  }
  0x6a   : > { %v355_v5 = vpop.permute.xlu2 %354 }
  0x6b   : > { %v358_v21 = vrot.slane %v355_v5, 4 }
  0x72   : > { %v318_v6 = vpop.permute.xlu2 %317 }
  0x73   : > { %v321_v7 = vrot.slane %v318_v6, 4 }
  0x8b   : > { %v339_v8 = vpop.permute.xlu0 %338  ;;  %v320_v9 = vpop.permute.xlu1 %319 }
  0x8c   : > { %v341_v11 = vrot.slane %v339_v8, 4  ;;  %v322_v12 = vrot.slane %v320_v9, 4 }
  0x8e   : > { %v345_v16 = vsel %vm343_vm0, %v339_v8, %v341_v11  ;;  %v327_v17 = vsel %vm325_vm1, %v320_v9, %v322_v12  ;;  %v324_v18 = vsel %vm323_vm2, %v321_v7, %v322_v12 }
  0x8f   : > { %349 = vst [vmem:[#allocation3 + $0x20] sm:$0xf] %v345_v16  ;;  %v326_v20 = vsel %vm325_vm1, %v318_v6, %v324_v18 }
  0x90   : > { %331 = vst [vmem:[#allocation3 + $0x14] sm:$0xf] %v327_v17 }
  0x91   : > { %330 = vst [vmem:[#allocation3 + $0xc] sm:$0xff] %v326_v20 }
  0x93   : > { %v357_v22 = vpop.permute.xlu0 %356  ;;  %v337_v23 = vpop.permute.xlu1 %336 }
  0x94   : > { %v359_v24 = vrot.slane %v357_v22, 4  ;;  %v340_v25 = vrot.slane %v337_v23, 4 }
  0x96   : > { %v360_v26 = vsel %vm323_vm2, %v358_v21, %v359_v24  ;;  %v363_v27 = vsel %vm361_vm3, %v357_v22, %v359_v24  ;;  %v342_v28 = vsel %vm323_vm2, %v340_v25, %v341_v11  ;;  %v675_v34 = vld [vmem:[#allocation3 + $0x20] sm:$0xf] }
  0x97   : > { %v362_v29 = vsel %vm361_vm3, %v355_v5, %v360_v26  ;;  %367 = vst [vmem:[#allocation3 + $0x2c] sm:$0xf] %v363_v27  ;;  %v344_v30 = vsel %vm343_vm0, %v337_v23, %v342_v28  ;;  %v692_v43 = vld [vmem:[#allocation3 + $0x10] sm:$0xf0] }
  0x98   : > { %366 = vst [vmem:[#allocation3 + $0x24] sm:$0xff] %v362_v29  ;;  %v691_v47 = vld [vmem:[#allocation3 + $0x8] sm:$0xf0]  ;;  %v664_v48 = vor.u32 %v692_v43, %v663_v40  ;;  %v657_v50 = vld [vmem:[#allocation3 + $0xc] sm:$0xf0] }
  0x99   : > { %348 = vst [vmem:[#allocation3 + $0x18] sm:$0xff] %v344_v30  ;;  %v656_v52 = vor.u32 %v691_v47, %v655_v46  ;;  %v660_v53 = vor.u32 %v690_v49, %v657_v50 }
  0x9b   : > { %v740_v55 = vpop.permute.xlu0 %739  ;;  %v746_v5 = vpop.permute.xlu1 %745 }
  0x9c   : > { %v741_v56 = vunpack.i.l.bf16 %v740_v55  ;;  %v742_v63 = vunpack.i.h.bf16 %v740_v55  ;;  %v747_v9 = vunpack.i.l.bf16 %v746_v5  ;;  %v748_v19 = vunpack.i.h.bf16 %v746_v5 }
  0x9e   : > { %v695_v35 = vld [vmem:[#allocation3 + $0x28] sm:$0xf0] }
  0x9f   : > { %v676_v37 = vor.u32 %v695_v35, %v675_v34  ;;  %v694_v38 = vld [vmem:[#allocation3 + $0x20] sm:$0xf0]  ;;  %v669_v39 = vld [vmem:[#allocation3 + $0x24] sm:$0xf0] }
  0xa0   : > { %v667_v41 = vld [vmem:[#allocation3 + $0x18] sm:$0xf]  ;;  %v693_v42 = vld [vmem:[#allocation3 + $0x1c] sm:$0xf] }
  0xa1   : > { %501 = vmatpush.bf16.msra.mxu2 %v676_v37  ;;  %v668_v44 = vor.u32 %v694_v38, %v667_v41  ;;  %v672_v45 = vor.u32 %v693_v42, %v669_v39 }
  0xa3   : > { %463 = vmatpush.bf16.msra.mxu0 %v668_v44  ;;  %706 = vmatpush.bf16.msra.mxu3 %v668_v44 }
  0xa4   : > { %482 = vmatpush.bf16.msra.mxu1 %v672_v45 }
  0xa5   : > { %502 = vmatpush.bf16.msra.mxu2 %v664_v48 }
  0xa7   : > { %464 = vmatpush.bf16.msra.mxu0 %v656_v52  ;;  %707 = vmatpush.bf16.msra.mxu3 %v656_v52 }
  0xa8   : > { %483 = vmatpush.bf16.msra.mxu1 %v660_v53  ;;  %681 = vmatmul.msk.bf16.vlgmr.msra.gmra.mxu2 %vm450_vm4, %v688_v51 }
  0xaa   : > { %677 = vmatmul.msk.bf16.vlgmr.msra.gmra.mxu0 %vm450_vm4, %v688_v51  ;;  %678 = vmatmul.msk.bf16.vlgmr.msra.gmra.mxu3 %vm450_vm4, %v689_v54 }
  0xab   : > { %679 = vmatmul.msk.bf16.vlgmr.msra.gmra.mxu1 %vm450_vm4, %v688_v51 }
  0xb8   : > { %682 = vmatmul.msk.bf16.gmra.mxu2 %vm450_vm4, %v689_v54 }
  0xbb   : > { %680 = vmatmul.msk.bf16.gmra.mxu1 %vm450_vm4, %v689_v54 }
 0x127   : > { %v466_v57 = vpop.f32.mrf.mxu0 }
 0x128   : > { %v485_v58 = vpop.f32.mrf.mxu1  ;;  %v467_v59 = vadd.f32 %v741_v56, %v466_v57 }
 0x129   : > { %v486_v60 = vadd.f32 %v741_v56, %v485_v58 }
 0x12b   : > { %v514_v61 = vpack.c.bf16 %v486_v60, %v467_v59  ;;  %v504_v62 = vpop.f32.mrf.mxu2 }
 0x12c   : > { %v505_v0 = vadd.f32 %v741_v56, %v504_v62 }
 0x12d   : > { %522 = vst [vmem:[%s852_s19] sm:$0xff] %v514_v61  ;;  %v471_v10 = vpop.f32.mrf.mxu3 }
 0x12e   : > { %v515_v1 = vpack.c.bf16 %v505_v0, %v505_v0  ;;  %v472_v13 = vadd.f32 %v747_v9, %v471_v10 }
 0x12f   : > { %v468_v2 = vpop.f32.mrf.mxu0 }
 0x130   : > { %523 = vst [vmem:[%s852_s19 + $0x8] sm:$0xf] %v515_v1  ;;  %v469_v3 = vadd.f32 %v742_v63, %v468_v2  ;;  %v487_v4 = vpop.f32.mrf.mxu1 }
 0x131   : > { %v488_v6 = vadd.f32 %v742_v63, %v487_v4 }
 0x133   : > { %v516_v7 = vpack.c.bf16 %v488_v6, %v469_v3  ;;  %v506_v8 = vpop.f32.mrf.mxu2 }
 0x134   : > { %v507_v11 = vadd.f32 %v742_v63, %v506_v8 }
 0x135   : > { %524 = vst [vmem:[%s852_s19 + $0xc] sm:$0xff] %v516_v7  ;;  %v473_v20 = vpop.f32.mrf.mxu3 }
 0x136   : > { %v517_v12 = vpack.c.bf16 %v507_v11, %v507_v11  ;;  %v474_v23 = vadd.f32 %v748_v19, %v473_v20 }
 0x138   : > { %525 = vst [vmem:[%s852_s19 + $0x14] sm:$0xf] %v517_v12  ;;  %v490_v14 = vpop.f32.mrf.mxu1 }
 0x139   : > { %v491_v15 = vadd.f32 %v747_v9, %v490_v14 }
 0x13b   : > { %v518_v16 = vpack.c.bf16 %v491_v15, %v472_v13  ;;  %v509_v17 = vpop.f32.mrf.mxu2 }
 0x13c   : > { %v510_v18 = vadd.f32 %v747_v9, %v509_v17 }
 0x13d   : > { %526 = vst [vmem:[%s852_s19 + $0x18] sm:$0xff] %v518_v16 }
 0x13e   : > { %v519_v21 = vpack.c.bf16 %v510_v18, %v510_v18 }
 0x140   : > { %527 = vst [vmem:[%s852_s19 + $0x20] sm:$0xf] %v519_v21  ;;  %v492_v22 = vpop.f32.mrf.mxu1 }
 0x141   : > { %v493_v24 = vadd.f32 %v748_v19, %v492_v22 }
 0x143   : > { %v520_v25 = vpack.c.bf16 %v493_v24, %v474_v23  ;;  %v511_v26 = vpop.f32.mrf.mxu2 }
 0x144   : > { %v512_v27 = vadd.f32 %v748_v19, %v511_v26 }
 0x145   : > { %528 = vst [vmem:[%s852_s19 + $0x24] sm:$0xff] %v520_v25 }
 0x146   : > { %v521_v28 = vpack.c.bf16 %v512_v27, %v512_v27 }
 0x148   : > { %529 = vst [vmem:[%s852_s19 + $0x2c] sm:$0xf] %v521_v28 }
 0x149 PF: > { %s14_s17 = sadd.s32 1, %s771_s17   ;;  %s876_s15 = smov %s767_s16 }
 0x14a   : > { %p11_p5 = scmp.ge.s32.totalorder %s14_s17, 4   ;;  %s877_s16 = smov %s879_s18 }
 0x14c   :  { %13 = sbr.rel (!%p11_p5) target bundleno = 2 (0x2), region = 69 }

// kernel: ait_module_forward.3
= control target key start
LH: loop header
LB: loop body
LE: loop exit
PB: predicated region body
PF: predicated region fallthrough
CT: control target
= control target key end

     0   :  { %s1235_s15 = smov 0   ;;  %s1237_s16 = smov 0   ;;  %s1443_s0 = inlined_call_operand.vmem [shape: bf16[32,32], index: 0, kind: input, shape index: {}]   ;;  %s1444_s1 = inlined_call_operand.vmem [shape: bf16[32,1], index: 1, kind: input, shape index: {}]   ;;  %s1445_s2 = inlined_call_operand.vmem [shape: bf16[2,8,1408], index: 2, kind: input, shape index: {}, may-alias: {2,3}]   ;;  %s1446_s3 = inlined_call_operand.vmem [shape: bf16[2,8,1408], index: 3, kind: input, shape index: {}, may-alias: {2,3}]   ;;  %s1447_s4 = inlined_call_operand.vmem [shape: bf16[2,32,1280], index: 4, kind: output, shape index: {}]  }
   0x1   :  { %s1239_s17 = smov 0  }
   0x2 LB: > { %s26_s18 = sadd.s32 1, %s1200_s16  ;;  %p987_p0 = scmp.ge.s32.totalorder %s1204_s17, 1  ;;  %s1204_s17 = sphi %s1239_s17, %s14_s17   ;;  %s1200_s16 = sphi %s1237_s16, %s1449_s16   ;;  %s1196_s15 = sphi %s1235_s15, %s1448_s15  }
   0x3   : > { %p28_p1 = scmp.ge.s32.totalorder %s26_s18, 2  ;;  %p214_p2 = scmp.lt.s32.totalorder %s1204_s17, 3 }
   0x5   : > { %s1451_s18 = smov (%p28_p1, %s26_s18), 0  ;;  %p215_p3 = pnand %p987_p0, %p214_p2 }
   0x6   : > { %p267_p4 = scmp.lt.s32.totalorder (!%p215_p3), %s1196_s15, 1  ;;  %s1206_s24 = smov (!%p215_p3), 91  }
   0x7   : > { %218 = sbr.rel (%p215_p3) target bundleno = 372 (0x174), region = 36  ;;  %s1207_s25 = smov (!%p215_p3), 92  }
   0x8   : > { %s1208_s29 = smov (!%p215_p3), 127  }
   0xc   : > { %s1453_s15 = smov (!%p267_p4, %s1196_s15), 1  ;;  %vm355_vm0 = vcmask 1043456   ;;  %vm357_vm1 = vcmask 1039360   ;;  %vm459_vm2 = vcmask 744448   ;;  %vm408_vm3 = vcmask 752640   ;;  %v1133_v33 = vld [vmem:[%s1444_s1 + $0x8] sm:$0xff]  }
   0xd   : > { %s1138_s19 = smul.u32 44, %s1453_s15  ;;  %v1126_v34 = vld [vmem:[%s1444_s1] sm:$0xff]   ;;  %v1131_v37 = vunpack.c.l.bf16 %v1133_v33  ;;  %v1132_v38 = vunpack.c.h.bf16 %v1133_v33  ;;  %v1209_v46 = vmov 0   ;;  %vm641_vm4 = vcmask 261120  }
   0xe   : > { %v1127_v42 = vunpack.c.l.bf16 %v1126_v34  ;;  %v1128_v45 = vunpack.c.h.bf16 %v1126_v34  ;;  %1176 = vset.pattern.permute.xlu1 %v1209_v46  ;;  %1170 = vset.pattern.permute.xlu0 %v1209_v46  ;;  %s1140_s12 = smul.u32 160, %s1453_s15 }
   0xf   : > { %s274_s22 = scalar_lea.vmem %s1445_s2, %s1138_s19  ;;  %s1102_s23 = sadd.s32 40, %s1138_s19  ;;  %v1177_v44 = vpack.i.bf16 %v1132_v38, %v1131_v37 }
  0x10   : > { %v303_v0 = vld [vmem:[%s274_s22] sm:$0xff]  ;;  %v304_v1 = vld [vmem:[%s274_s22 + $0x8] sm:$0xff]  ;;  %s289_s28 = scalar_lea.vmem %s1446_s3, %s1102_s23  ;;  %v305_v2 = vld [vmem:[%s274_s22 + $0x10] sm:$0xff]  ;;  %v1171_v47 = vpack.i.bf16 %v1128_v45, %v1127_v42  ;;  %s1368_s19 = scalar_lea.vmem %s1447_s4, %s1140_s12 }
  0x11   : > { %440 = vrot.lane.b32.xlu1 %v303_v0, %s1206_s24  ;;  %389 = vrot.lane.b32.xlu0 %v303_v0, %s1207_s25  ;;  %v306_v3 = vld [vmem:[%s274_s22 + $0x18] sm:$0xff]  ;;  %v313_v4 = vld [vmem:[%s289_s28] sm:$0xf]  ;;  %320 = vst [vmem:[#allocation3] sm:$0xff] %v303_v0 }
  0x12   : > { %337 = vrot.lane.b32.xlu2 %v303_v0, %s1208_s29  ;;  %v307_v5 = vld [vmem:[%s274_s22 + $0x20] sm:$0xff]  ;;  %314 = vst [vmem:[#allocation2 + $0x28] sm:$0xf] %v313_v4 }
  0x13   : > { %321 = vst [vmem:[#allocation3 + $0x8] sm:$0xff] %v304_v1 }
  0x14   : > { %322 = vst [vmem:[#allocation3 + $0x10] sm:$0xff] %v305_v2 }
  0x15   : > { %323 = vst [vmem:[#allocation3 + $0x18] sm:$0xff] %v306_v3 }
  0x16   : > { %324 = vst [vmem:[#allocation3 + $0x20] sm:$0xff] %v307_v5 }
  0x19   : > { %442 = vrot.lane.b32.xlu1 %v304_v1, %s1206_s24  ;;  %391 = vrot.lane.b32.xlu0 %v304_v1, %s1207_s25  ;;  %v433_v6 = vld [vmem:[#allocation2 + $0x28] sm:$0xf] }
  0x1a   : > { %339 = vrot.lane.b32.xlu2 %v304_v1, %s1208_s29  ;;  %v382_v7 = vld [vmem:[#allocation2 + $0x28] sm:$0xf] }
  0x1b   : > { %v330_v8 = vld [vmem:[#allocation2 + $0x28] sm:$0xf]  ;;  %v1107_v46 = vld [vmem:[#allocation3 + $0x14] sm:$0xf] }
  0x21   : > { %444 = vrot.lane.b32.xlu1 %v305_v2, %s1206_s24  ;;  %393 = vrot.lane.b32.xlu0 %v305_v2, %s1207_s25 }
  0x22   : > { %341 = vrot.lane.b32.xlu2 %v305_v2, %s1208_s29  ;;  %v1001_v2 = vld [vmem:[#allocation3] sm:$0xf] }
  0x29   : > { %446 = vrot.lane.b32.xlu1 %v306_v3, %s1206_s24  ;;  %395 = vrot.lane.b32.xlu0 %v306_v3, %s1207_s25 }
  0x2a   : > { %343 = vrot.lane.b32.xlu2 %v306_v3, %s1208_s29 }
  0x31   : > { %448 = vrot.lane.b32.xlu1 %v307_v5, %s1206_s24  ;;  %397 = vrot.lane.b32.xlu0 %v307_v5, %s1207_s25 }
  0x32   : > { %345 = vrot.lane.b32.xlu2 %v307_v5, %s1208_s29 }
  0x39   : > { %450 = vrot.lane.b32.xlu1 %v433_v6, %s1206_s24  ;;  %399 = vrot.lane.b32.xlu0 %v382_v7, %s1207_s25  ;;  %v1105_v6 = vld [vmem:[#allocation3 + $0x4] sm:$0xf] }
  0x3a   : > { %347 = vrot.lane.b32.xlu2 %v330_v8, %s1208_s29 }
  0x41   : > { %1178 = vperm.xlu1 %1176, %v1177_v44   ;;  %1172 = vperm.xlu0 %1170, %v1171_v47   ;;  %v1017_v44 = vld [vmem:[#allocation3 + $0x10] sm:$0xf] }
  0x6c   : > { %v338_v9 = vpop.permute.xlu2 %337 }
  0x6d   : > { %v349_v10 = vrot.slane %v338_v9, 4 }
  0x74   : > { %v340_v11 = vpop.permute.xlu2 %339 }
  0x75   : > { %v350_v12 = vrot.slane %v340_v11, 4 }
  0x77   : > { %v356_v13 = vsel %vm355_vm0, %v349_v10, %v350_v12 }
  0x78   : > { %v358_v14 = vsel %vm357_vm1, %v338_v9, %v356_v13 }
  0x79   : > { %372 = vst [vmem:[#allocation3 + $0x28] sm:$0xff] %v358_v14  ;;  %v1303_v14 = vld [vmem:[%s1443_s0 + $0x8] sm:$0xff] }
  0x7c   : > { %v342_v15 = vpop.permute.xlu2 %341 }
  0x7d   : > { %v351_v16 = vrot.slane %v342_v15, 4 }
  0x7f   : > { %v359_v17 = vsel %vm355_vm0, %v350_v12, %v351_v16 }
  0x80   : > { %v360_v18 = vsel %vm357_vm1, %v340_v11, %v359_v17  ;;  %v1110_v3 = vld [vmem:[#allocation3 + $0x24] sm:$0xf0]  ;;  %v1003_v7 = vld [vmem:[#allocation3 + $0x28] sm:$0xf0] }
  0x81   : > { %373 = vst [vmem:[#allocation3 + $0x30] sm:$0xff] %v360_v18  ;;  %v1002_v10 = vor.u32 %v1110_v3, %v1001_v2  ;;  %v1006_v13 = vor.u32 %v1105_v6, %v1003_v7  ;;  %v1108_v2 = vld [vmem:[#allocation3 + $0x1c] sm:$0xf]  ;;  %v1033_v6 = vld [vmem:[#allocation3 + $0x20] sm:$0xf] }
  0x82   : > { %v1109_v7 = vld [vmem:[#allocation3 + $0x24] sm:$0xf] }
  0x83   : > { %v441_v19 = vpop.permute.xlu1 %440  ;;  %v390_v20 = vpop.permute.xlu0 %389 }
  0x84   : > { %v344_v21 = vpop.permute.xlu2 %343  ;;  %v452_v27 = vrot.slane %v441_v19, 4  ;;  %v401_v28 = vrot.slane %v390_v20, 4 }
  0x85   : > { %v352_v22 = vrot.slane %v344_v21, 4 }
  0x87   : > { %v361_v23 = vsel %vm355_vm0, %v351_v16, %v352_v22 }
  0x88   : > { %v362_v24 = vsel %vm357_vm1, %v342_v15, %v361_v23  ;;  %v1308_v15 = vld [vmem:[%s1443_s0] sm:$0xff] }
  0x89   : > { %374 = vst [vmem:[#allocation3 + $0x38] sm:$0xff] %v362_v24  ;;  %v1009_v24 = vld [vmem:[#allocation3 + $0x8] sm:$0xf] }
  0x8b   : > { %v443_v25 = vpop.permute.xlu1 %442  ;;  %v392_v26 = vpop.permute.xlu0 %391 }
  0x8c   : > { %v453_v29 = vrot.slane %v443_v25, 4  ;;  %v402_v30 = vrot.slane %v392_v26, 4  ;;  %v346_v31 = vpop.permute.xlu2 %345 }
  0x8d   : > { %v353_v32 = vrot.slane %v346_v31, 4 }
  0x8e   : > { %v458_v35 = vsel %vm355_vm0, %v452_v27, %v453_v29  ;;  %v407_v36 = vsel %vm355_vm0, %v401_v28, %v402_v30  ;;  %v1111_v27 = vld [vmem:[#allocation3 + $0x2c] sm:$0xf0]  ;;  %v1106_v28 = vld [vmem:[#allocation3 + $0xc] sm:$0xf] }
  0x8f   : > { %v460_v39 = vsel %vm459_vm2, %v441_v19, %v458_v35  ;;  %v409_v40 = vsel %vm408_vm3, %v390_v20, %v407_v36  ;;  %v363_v41 = vsel %vm355_vm0, %v352_v22, %v353_v32  ;;  %v1010_v34 = vor.u32 %v1111_v27, %v1009_v24 }
  0x90   : > { %474 = vst [vmem:[#allocation3 + $0x78] sm:$0xff] %v460_v39  ;;  %v364_v43 = vsel %vm357_vm1, %v344_v21, %v363_v41  ;;  %v1112_v45 = vld [vmem:[#allocation3 + $0x34] sm:$0xf0]  ;;  %v1019_v47 = vld [vmem:[#allocation3 + $0x38] sm:$0xf0] }
  0x91   : > { %423 = vst [vmem:[#allocation3 + $0x50] sm:$0xff] %v409_v40 }
  0x92   : > { %375 = vst [vmem:[#allocation3 + $0x40] sm:$0xff] %v364_v43 }
  0x93   : > { %v445_v48 = vpop.permute.xlu1 %444  ;;  %v394_v49 = vpop.permute.xlu0 %393 }
  0x94   : > { %v454_v50 = vrot.slane %v445_v48, 4  ;;  %v403_v51 = vrot.slane %v394_v49, 4  ;;  %v348_v52 = vpop.permute.xlu2 %347 }
  0x95   : > { %v354_v53 = vrot.slane %v348_v52, 4  ;;  %v1018_v52 = vor.u32 %v1112_v45, %v1017_v44 }
  0x96   : > { %v461_v54 = vsel %vm355_vm0, %v453_v29, %v454_v50  ;;  %v410_v55 = vsel %vm355_vm0, %v402_v30, %v403_v51  ;;  %v1011_v29 = vld [vmem:[#allocation3 + $0x30] sm:$0xf0] }
  0x97   : > { %v462_v56 = vsel %vm459_vm2, %v443_v25, %v461_v54  ;;  %v411_v57 = vsel %vm408_vm3, %v392_v26, %v410_v55  ;;  %v1120_v58 = vld [vmem:[#allocation3 + $0x74] sm:$0xf0]  ;;  %v1043_v59 = vld [vmem:[#allocation3 + $0x78] sm:$0xf0]  ;;  %v365_v60 = vsel %vm355_vm0, %v353_v32, %v354_v53  ;;  %v1014_v35 = vor.u32 %v1106_v28, %v1011_v29 }
  0x98   : > { %475 = vst [vmem:[#allocation3 + $0x80] sm:$0xff] %v462_v56  ;;  %v1041_v61 = vld [vmem:[#allocation3 + $0x50] sm:$0xf]  ;;  %v1115_v62 = vld [vmem:[#allocation3 + $0x54] sm:$0xf]  ;;  %v366_v63 = vsel %vm357_vm1, %v346_v31, %v365_v60  ;;  %v1022_v53 = vor.u32 %v1107_v46, %v1019_v47 }
  0x99   : > { %424 = vst [vmem:[#allocation3 + $0x58] sm:$0xff] %v411_v57  ;;  %v1042_v0 = vor.u32 %v1120_v58, %v1041_v61  ;;  %v1046_v1 = vor.u32 %v1115_v62, %v1043_v59  ;;  %v1027_v3 = vld [vmem:[#allocation3 + $0x40] sm:$0xf0] }
  0x9a   : > { %376 = vst [vmem:[#allocation3 + $0x48] sm:$0xff] %v366_v63 }
  0x9b   : > { %654 = vmatpush.bf16.msra.mxu0 %v1042_v0  ;;  %1134 = vmatpush.bf16.msra.mxu2 %v1042_v0  ;;  %v447_v4 = vpop.permute.xlu1 %446  ;;  %v396_v5 = vpop.permute.xlu0 %395  ;;  %v1025_v0 = vld [vmem:[#allocation3 + $0x18] sm:$0xf] }
  0x9c   : > { %673 = vmatpush.bf16.msra.mxu1 %v1046_v1  ;;  %1136 = vmatpush.bf16.msra.mxu3 %v1046_v1  ;;  %v455_v8 = vrot.slane %v447_v4, 4  ;;  %v404_v9 = vrot.slane %v396_v5, 4  ;;  %v1113_v1 = vld [vmem:[#allocation3 + $0x3c] sm:$0xf0] }
  0x9e   : > { %v463_v11 = vsel %vm355_vm0, %v454_v50, %v455_v8  ;;  %v412_v12 = vsel %vm355_vm0, %v403_v51, %v404_v9 }
  0x9f   : > { %v464_v16 = vsel %vm459_vm2, %v445_v48, %v463_v11  ;;  %v413_v17 = vsel %vm408_vm3, %v394_v49, %v412_v12  ;;  %655 = vmatpush.bf16.msra.mxu0 %v1002_v10  ;;  %1135 = vmatpush.bf16.msra.mxu2 %v1002_v10  ;;  %v1121_v18 = vld [vmem:[#allocation3 + $0x7c] sm:$0xf0]  ;;  %v1051_v19 = vld [vmem:[#allocation3 + $0x80] sm:$0xf0] }
  0xa0   : > { %476 = vst [vmem:[#allocation3 + $0x88] sm:$0xff] %v464_v16  ;;  %674 = vmatpush.bf16.msra.mxu1 %v1006_v13  ;;  %1137 = vmatpush.bf16.msra.mxu3 %v1006_v13  ;;  %v1049_v20 = vld [vmem:[#allocation3 + $0x58] sm:$0xf]  ;;  %v1116_v21 = vld [vmem:[#allocation3 + $0x5c] sm:$0xf] }
  0xa1   : > { %425 = vst [vmem:[#allocation3 + $0x60] sm:$0xff] %v413_v17  ;;  %v1050_v22 = vor.u32 %v1121_v18, %v1049_v20  ;;  %v1054_v23 = vor.u32 %v1116_v21, %v1051_v19  ;;  %v1114_v10 = vld [vmem:[#allocation3 + $0x44] sm:$0xf0]  ;;  %v1035_v13 = vld [vmem:[#allocation3 + $0x48] sm:$0xf0] }
  0xa2   : > { %1080 = vmatmul.msk.bf16.vlgmr.msra.gmra.mxu2 %vm641_vm4, %v1303_v14  ;;  %1079 = vmatmul.msk.bf16.vlgmr.msra.gmra.mxu0 %vm641_vm4, %v1308_v15  ;;  %v1034_v18 = vor.u32 %v1114_v10, %v1033_v6  ;;  %v1038_v19 = vor.u32 %v1109_v7, %v1035_v13 }
  0xa3   : > { %1082 = vmatmul.msk.bf16.vlgmr.msra.gmra.mxu3 %vm641_vm4, %v1303_v14  ;;  %1081 = vmatmul.msk.bf16.vlgmr.msra.gmra.mxu1 %vm641_vm4, %v1308_v15  ;;  %v449_v25 = vpop.permute.xlu1 %448  ;;  %v398_v26 = vpop.permute.xlu0 %397 }
  0xa4   : > { %692 = vmatpush.bf16.msrb.mxu2 %v1050_v22  ;;  %711 = vmatpush.bf16.msrb.mxu3 %v1054_v23  ;;  %v456_v30 = vrot.slane %v449_v25, 4  ;;  %v405_v31 = vrot.slane %v398_v26, 4 }
  0xa6   : > { %v465_v32 = vsel %vm355_vm0, %v455_v8, %v456_v30  ;;  %v414_v33 = vsel %vm355_vm0, %v404_v9, %v405_v31 }
  0xa7   : > { %v466_v36 = vsel %vm459_vm2, %v447_v4, %v465_v32  ;;  %v415_v37 = vsel %vm408_vm3, %v396_v5, %v414_v33  ;;  %v1122_v38 = vld [vmem:[#allocation3 + $0x84] sm:$0xf0]  ;;  %v1059_v39 = vld [vmem:[#allocation3 + $0x88] sm:$0xf0]  ;;  %v1026_v4 = vor.u32 %v1113_v1, %v1025_v0  ;;  %v1030_v5 = vor.u32 %v1108_v2, %v1027_v3 }
  0xa8   : > { %477 = vst [vmem:[#allocation3 + $0x90] sm:$0xff] %v466_v36  ;;  %693 = vmatpush.bf16.msrb.mxu2 %v1010_v34  ;;  %712 = vmatpush.bf16.msrb.mxu3 %v1014_v35  ;;  %v1057_v40 = vld [vmem:[#allocation3 + $0x60] sm:$0xf]  ;;  %v1117_v41 = vld [vmem:[#allocation3 + $0x64] sm:$0xf] }
  0xa9   : > { %426 = vst [vmem:[#allocation3 + $0x68] sm:$0xff] %v415_v37  ;;  %v1058_v42 = vor.u32 %v1122_v38, %v1057_v40  ;;  %v1062_v43 = vor.u32 %v1117_v41, %v1059_v39 }
  0xab   : > { %730 = vmatpush.bf16.msrb.mxu0 %v1058_v42  ;;  %749 = vmatpush.bf16.msrb.mxu1 %v1062_v43  ;;  %v451_v48 = vpop.permute.xlu1 %450  ;;  %v400_v49 = vpop.permute.xlu0 %399 }
  0xac   : > { %v457_v50 = vrot.slane %v451_v48, 4  ;;  %v406_v51 = vrot.slane %v400_v49, 4 }
  0xae   : > { %v467_v54 = vsel %vm355_vm0, %v456_v30, %v457_v50  ;;  %v416_v55 = vsel %vm355_vm0, %v405_v31, %v406_v51 }
  0xaf   : > { %v468_v56 = vsel %vm459_vm2, %v449_v25, %v467_v54  ;;  %v417_v57 = vsel %vm408_vm3, %v398_v26, %v416_v55  ;;  %731 = vmatpush.bf16.msrb.mxu0 %v1018_v52  ;;  %750 = vmatpush.bf16.msrb.mxu1 %v1022_v53  ;;  %v1123_v58 = vld [vmem:[#allocation3 + $0x8c] sm:$0xf0]  ;;  %v1067_v59 = vld [vmem:[#allocation3 + $0x90] sm:$0xf0] }
  0xb0   : > { %478 = vst [vmem:[#allocation3 + $0x98] sm:$0xff] %v468_v56  ;;  %v1065_v60 = vld [vmem:[#allocation3 + $0x68] sm:$0xf]  ;;  %v1118_v61 = vld [vmem:[#allocation3 + $0x6c] sm:$0xf] }
  0xb1   : > { %427 = vst [vmem:[#allocation3 + $0x70] sm:$0xff] %v417_v57  ;;  %v1066_v62 = vor.u32 %v1123_v58, %v1065_v60  ;;  %v1070_v63 = vor.u32 %v1118_v61, %v1067_v59 }
  0xb2   : > { %1083 = vmatmul.msk.bf16.vlgmr.msrb.gmra.mxu2 %vm641_vm4, %v1308_v15  ;;  %1087 = vmatmul.msk.bf16.vlgmr.msrb.gmra.mxu0 %vm641_vm4, %v1308_v15 }
  0xb3   : > { %1085 = vmatmul.msk.bf16.vlgmr.msrb.gmra.mxu3 %vm641_vm4, %v1308_v15  ;;  %1089 = vmatmul.msk.bf16.vlgmr.msrb.gmra.mxu1 %vm641_vm4, %v1308_v15  ;;  %v1173_v20 = vpop.permute.xlu0 %1172  ;;  %v1179_v23 = vpop.permute.xlu1 %1178 }
  0xb4   : > { %768 = vmatpush.bf16.msra.mxu2 %v1066_v62  ;;  %787 = vmatpush.bf16.msra.mxu3 %v1070_v63  ;;  %v1360_v21 = vunpack.i.l.bf16 %v1173_v20  ;;  %v1370_v26 = vunpack.i.l.bf16 %v1179_v23  ;;  %v1372_v27 = vunpack.i.h.bf16 %v1173_v20  ;;  %v1379_v37 = vunpack.i.h.bf16 %v1179_v23 }
  0xb7   : > { %v1124_v8 = vld [vmem:[#allocation3 + $0x94] sm:$0xf0]  ;;  %v1075_v9 = vld [vmem:[#allocation3 + $0x98] sm:$0xf0] }
  0xb8   : > { %769 = vmatpush.bf16.msra.mxu2 %v1026_v4  ;;  %788 = vmatpush.bf16.msra.mxu3 %v1030_v5  ;;  %v1073_v11 = vld [vmem:[#allocation3 + $0x70] sm:$0xf]  ;;  %v1119_v12 = vld [vmem:[#allocation3 + $0x74] sm:$0xf] }
  0xb9   : > { %v1074_v16 = vor.u32 %v1124_v8, %v1073_v11  ;;  %v1078_v17 = vor.u32 %v1119_v12, %v1075_v9 }
  0xbb   : > { %806 = vmatpush.bf16.msra.mxu0 %v1074_v16  ;;  %825 = vmatpush.bf16.msra.mxu1 %v1078_v17 }
  0xbf   : > { %807 = vmatpush.bf16.msra.mxu0 %v1034_v18  ;;  %826 = vmatpush.bf16.msra.mxu1 %v1038_v19 }
  0xc2   : > { %1084 = vmatmul.msk.bf16.gmra.mxu2 %vm641_vm4, %v1303_v14  ;;  %1088 = vmatmul.msk.bf16.gmra.mxu0 %vm641_vm4, %v1303_v14 }
  0xc3   : > { %1086 = vmatmul.msk.bf16.gmra.mxu3 %vm641_vm4, %v1303_v14  ;;  %1090 = vmatmul.msk.bf16.gmra.mxu1 %vm641_vm4, %v1303_v14 }
  0xd2   : > { %1091 = vmatmul.msk.bf16.vlgmr.msra.gmra.mxu2 %vm641_vm4, %v1308_v15  ;;  %1095 = vmatmul.msk.bf16.vlgmr.msra.gmra.mxu0 %vm641_vm4, %v1308_v15 }
  0xd3   : > { %1093 = vmatmul.msk.bf16.vlgmr.msra.gmra.mxu3 %vm641_vm4, %v1308_v15  ;;  %1097 = vmatmul.msk.bf16.vlgmr.msra.gmra.mxu1 %vm641_vm4, %v1308_v15 }
  0xe2   : > { %1092 = vmatmul.msk.bf16.gmra.mxu2 %vm641_vm4, %v1303_v14  ;;  %1096 = vmatmul.msk.bf16.gmra.mxu0 %vm641_vm4, %v1303_v14 }
  0xe3   : > { %1094 = vmatmul.msk.bf16.gmra.mxu3 %vm641_vm4, %v1303_v14  ;;  %1098 = vmatmul.msk.bf16.gmra.mxu1 %vm641_vm4, %v1303_v14 }
 0x11f   : > { %v657_v22 = vpop.f32.mrf.mxu0 }
 0x120   : > { %v676_v24 = vpop.f32.mrf.mxu1  ;;  %v658_v15 = vadd.f32 %v1360_v21, %v657_v22 }
 0x121   : > { %v677_v25 = vadd.f32 %v1360_v21, %v676_v24 }
 0x123   : > { %v838_v14 = vpack.c.bf16 %v677_v25, %v658_v15 }
 0x125   : > { %v662_v28 = vpop.f32.mrf.mxu2  ;;  %858 = vst [vmem:[%s1368_s19] sm:$0xff] %v838_v14 }
 0x126   : > { %v681_v29 = vpop.f32.mrf.mxu3  ;;  %v663_v30 = vadd.f32 %v1370_v26, %v662_v28 }
 0x127   : > { %v682_v31 = vadd.f32 %v1370_v26, %v681_v29  ;;  %v659_v32 = vpop.f32.mrf.mxu0 }
 0x128   : > { %v660_v33 = vadd.f32 %v1372_v27, %v659_v32  ;;  %v678_v34 = vpop.f32.mrf.mxu1 }
 0x129   : > { %v848_v35 = vpack.c.bf16 %v682_v31, %v663_v30  ;;  %v679_v36 = vadd.f32 %v1372_v27, %v678_v34 }
 0x12b   : > { %868 = vst [vmem:[%s1368_s19 + $0x50] sm:$0xff] %v848_v35  ;;  %v843_v38 = vpack.c.bf16 %v679_v36, %v660_v33 }
 0x12d   : > { %863 = vst [vmem:[%s1368_s19 + $0x28] sm:$0xff] %v843_v38  ;;  %v664_v39 = vpop.f32.mrf.mxu2 }
 0x12e   : > { %v665_v40 = vadd.f32 %v1379_v37, %v664_v39  ;;  %v683_v41 = vpop.f32.mrf.mxu3 }
 0x12f   : > { %v684_v42 = vadd.f32 %v1379_v37, %v683_v41  ;;  %v733_v43 = vpop.f32.mrf.mxu0 }
 0x130   : > { %v734_v44 = vadd.f32 %v1360_v21, %v733_v43  ;;  %v752_v45 = vpop.f32.mrf.mxu1 }
 0x131   : > { %v853_v46 = vpack.c.bf16 %v684_v42, %v665_v40  ;;  %v753_v47 = vadd.f32 %v1360_v21, %v752_v45 }
 0x133   : > { %873 = vst [vmem:[%s1368_s19 + $0x78] sm:$0xff] %v853_v46  ;;  %v840_v48 = vpack.c.bf16 %v753_v47, %v734_v44 }
 0x135   : > { %860 = vst [vmem:[%s1368_s19 + $0x10] sm:$0xff] %v840_v48  ;;  %v695_v49 = vpop.f32.mrf.mxu2 }
 0x136   : > { %v696_v50 = vadd.f32 %v1360_v21, %v695_v49  ;;  %v714_v51 = vpop.f32.mrf.mxu3 }
 0x137   : > { %v715_v52 = vadd.f32 %v1360_v21, %v714_v51  ;;  %v735_v53 = vpop.f32.mrf.mxu0 }
 0x138   : > { %v736_v54 = vadd.f32 %v1372_v27, %v735_v53  ;;  %v754_v55 = vpop.f32.mrf.mxu1 }
 0x139   : > { %v839_v56 = vpack.c.bf16 %v715_v52, %v696_v50  ;;  %v755_v57 = vadd.f32 %v1372_v27, %v754_v55 }
 0x13b   : > { %859 = vst [vmem:[%s1368_s19 + $0x8] sm:$0xff] %v839_v56  ;;  %v845_v58 = vpack.c.bf16 %v755_v57, %v736_v54 }
 0x13d   : > { %865 = vst [vmem:[%s1368_s19 + $0x38] sm:$0xff] %v845_v58  ;;  %v697_v59 = vpop.f32.mrf.mxu2 }
 0x13e   : > { %v698_v60 = vadd.f32 %v1372_v27, %v697_v59  ;;  %v716_v61 = vpop.f32.mrf.mxu3 }
 0x13f   : > { %v717_v62 = vadd.f32 %v1372_v27, %v716_v61  ;;  %v738_v63 = vpop.f32.mrf.mxu0 }
 0x140   : > { %v739_v0 = vadd.f32 %v1370_v26, %v738_v63  ;;  %v757_v1 = vpop.f32.mrf.mxu1 }
 0x141   : > { %v844_v2 = vpack.c.bf16 %v717_v62, %v698_v60  ;;  %v758_v3 = vadd.f32 %v1370_v26, %v757_v1 }
 0x143   : > { %864 = vst [vmem:[%s1368_s19 + $0x30] sm:$0xff] %v844_v2  ;;  %v850_v4 = vpack.c.bf16 %v758_v3, %v739_v0 }
 0x145   : > { %870 = vst [vmem:[%s1368_s19 + $0x60] sm:$0xff] %v850_v4  ;;  %v700_v5 = vpop.f32.mrf.mxu2 }
 0x146   : > { %v701_v6 = vadd.f32 %v1370_v26, %v700_v5  ;;  %v719_v7 = vpop.f32.mrf.mxu3 }
 0x147   : > { %v720_v8 = vadd.f32 %v1370_v26, %v719_v7  ;;  %v740_v9 = vpop.f32.mrf.mxu0 }
 0x148   : > { %v741_v10 = vadd.f32 %v1379_v37, %v740_v9  ;;  %v759_v11 = vpop.f32.mrf.mxu1 }
 0x149   : > { %v849_v12 = vpack.c.bf16 %v720_v8, %v701_v6  ;;  %v760_v13 = vadd.f32 %v1379_v37, %v759_v11 }
 0x14b   : > { %869 = vst [vmem:[%s1368_s19 + $0x58] sm:$0xff] %v849_v12  ;;  %v855_v16 = vpack.c.bf16 %v760_v13, %v741_v10 }
 0x14d   : > { %875 = vst [vmem:[%s1368_s19 + $0x88] sm:$0xff] %v855_v16  ;;  %v702_v17 = vpop.f32.mrf.mxu2 }
 0x14e   : > { %v703_v18 = vadd.f32 %v1379_v37, %v702_v17  ;;  %v721_v19 = vpop.f32.mrf.mxu3 }
 0x14f   : > { %v722_v20 = vadd.f32 %v1379_v37, %v721_v19  ;;  %v809_v22 = vpop.f32.mrf.mxu0 }
 0x150   : > { %v810_v23 = vadd.f32 %v1360_v21, %v809_v22  ;;  %v828_v24 = vpop.f32.mrf.mxu1 }
 0x151   : > { %v854_v15 = vpack.c.bf16 %v722_v20, %v703_v18  ;;  %v829_v25 = vadd.f32 %v1360_v21, %v828_v24 }
 0x153   : > { %874 = vst [vmem:[%s1368_s19 + $0x80] sm:$0xff] %v854_v15  ;;  %v842_v14 = vpack.c.bf16 %v829_v25, %v810_v23 }
 0x155   : > { %862 = vst [vmem:[%s1368_s19 + $0x20] sm:$0xff] %v842_v14  ;;  %v771_v28 = vpop.f32.mrf.mxu2 }
 0x156   : > { %v772_v29 = vadd.f32 %v1360_v21, %v771_v28  ;;  %v790_v30 = vpop.f32.mrf.mxu3 }
 0x157   : > { %v791_v31 = vadd.f32 %v1360_v21, %v790_v30  ;;  %v811_v32 = vpop.f32.mrf.mxu0 }
 0x158   : > { %v812_v33 = vadd.f32 %v1372_v27, %v811_v32  ;;  %v830_v34 = vpop.f32.mrf.mxu1 }
 0x159   : > { %v841_v35 = vpack.c.bf16 %v791_v31, %v772_v29  ;;  %v831_v36 = vadd.f32 %v1372_v27, %v830_v34 }
 0x15b   : > { %861 = vst [vmem:[%s1368_s19 + $0x18] sm:$0xff] %v841_v35  ;;  %v847_v38 = vpack.c.bf16 %v831_v36, %v812_v33 }
 0x15d   : > { %867 = vst [vmem:[%s1368_s19 + $0x48] sm:$0xff] %v847_v38  ;;  %v773_v39 = vpop.f32.mrf.mxu2 }
 0x15e   : > { %v774_v40 = vadd.f32 %v1372_v27, %v773_v39  ;;  %v792_v41 = vpop.f32.mrf.mxu3 }
 0x15f   : > { %v793_v42 = vadd.f32 %v1372_v27, %v792_v41  ;;  %v814_v43 = vpop.f32.mrf.mxu0 }
 0x160   : > { %v815_v21 = vadd.f32 %v1370_v26, %v814_v43  ;;  %v833_v44 = vpop.f32.mrf.mxu1 }
 0x161   : > { %v846_v45 = vpack.c.bf16 %v793_v42, %v774_v40  ;;  %v834_v46 = vadd.f32 %v1370_v26, %v833_v44 }
 0x163   : > { %866 = vst [vmem:[%s1368_s19 + $0x40] sm:$0xff] %v846_v45  ;;  %v852_v47 = vpack.c.bf16 %v834_v46, %v815_v21 }
 0x165   : > { %872 = vst [vmem:[%s1368_s19 + $0x70] sm:$0xff] %v852_v47  ;;  %v776_v48 = vpop.f32.mrf.mxu2 }
 0x166   : > { %v777_v49 = vadd.f32 %v1370_v26, %v776_v48  ;;  %v795_v50 = vpop.f32.mrf.mxu3 }
 0x167   : > { %v796_v51 = vadd.f32 %v1370_v26, %v795_v50  ;;  %v816_v27 = vpop.f32.mrf.mxu0 }
 0x168   : > { %v817_v52 = vadd.f32 %v1379_v37, %v816_v27  ;;  %v835_v53 = vpop.f32.mrf.mxu1 }
 0x169   : > { %v851_v54 = vpack.c.bf16 %v796_v51, %v777_v49  ;;  %v836_v55 = vadd.f32 %v1379_v37, %v835_v53 }
 0x16b   : > { %871 = vst [vmem:[%s1368_s19 + $0x68] sm:$0xff] %v851_v54  ;;  %v857_v56 = vpack.c.bf16 %v836_v55, %v817_v52 }
 0x16d   : > { %877 = vst [vmem:[%s1368_s19 + $0x98] sm:$0xff] %v857_v56  ;;  %v778_v57 = vpop.f32.mrf.mxu2 }
 0x16e   : > { %v779_v58 = vadd.f32 %v1379_v37, %v778_v57  ;;  %v797_v59 = vpop.f32.mrf.mxu3 }
 0x16f   : > { %v798_v60 = vadd.f32 %v1379_v37, %v797_v59 }
 0x171   : > { %v856_v61 = vpack.c.bf16 %v798_v60, %v779_v58 }
 0x173   : > { %876 = vst [vmem:[%s1368_s19 + $0x90] sm:$0xff] %v856_v61 }
 0x174 PF: > { %s14_s17 = sadd.s32 1, %s1204_s17   ;;  %s1448_s15 = smov %s1200_s16 }
 0x175   : > { %p11_p5 = scmp.ge.s32.totalorder %s14_s17, 4   ;;  %s1449_s16 = smov %s1451_s18 }
 0x177   :  { %13 = sbr.rel (!%p11_p5) target bundleno = 2 (0x2), region = 69 }

</bundles_post_ra>
